<compile_context>
chip_gen: v5e
topology: v5e:2x2
jax: 0.10.0
libtpu: 0.0.40
codegen_flags: <defaults>
</compile_context>

<pallas_src>
import functools
import math

import jax
import jax.numpy as jnp
from jax.experimental import pallas as pl
from jax.experimental.pallas import tpu as pltpu


def _cond_ln_kernel(x_ref, scale_ref, bias_ref, o_ref, *, epsilon):
    # x_ref/o_ref:        (rows_tile, C) rows of the flattened [T*B, C] tensor.
    # scale_ref/bias_ref: (rows_tile, C) pre-tiled, grid-invariant modulation
    #                     (row j modulates batch j % B); resident across steps.
    x = x_ref[...].astype(jnp.float32)
    mean = jnp.mean(x, axis=-1, keepdims=True)
    xc = x - mean                                  # centered once, reused
    var = jnp.mean(xc * xc, axis=-1, keepdims=True)
    y = xc * jax.lax.rsqrt(var + epsilon)          # EUP rsqrt + VPU multiply
    o_ref[...] = (y * scale_ref[...] + bias_ref[...]).astype(o_ref.dtype)


def _vmem_capacity_bytes():
    try:
        return int(pltpu.get_tpu_info().vmem_capacity_bytes)
    except Exception:
        return 64 * 1024 * 1024  # conservative default: assume v7x-sized VMEM


def conditional_layer_norm(x, speaker_embedding, w_scale, b_scale,
                           w_bias, b_bias, *, epsilon=1e-5,
                           x_block_bytes=None, vmem_limit_bytes=None,
                           donate_x=False):
    """x: [T, B, C]; speaker_embedding: [B, 1, C]; W_*: [C, C]; b_*: [C]."""
    T, B, C = x.shape
    rows = T * B

    # --- Hoisted, grid-invariant projections (nn.Linear: spk @ W.T + b). ---
    spk = speaker_embedding.reshape(B, C).astype(jnp.float32)
    hi = jax.lax.Precision.HIGHEST
    scale = jnp.matmul(spk, w_scale.astype(jnp.float32).T, precision=hi) \
        + b_scale.astype(jnp.float32)                                   # (B, C)
    bias = jnp.matmul(spk, w_bias.astype(jnp.float32).T, precision=hi) \
        + b_bias.astype(jnp.float32)                                    # (B, C)

    # --- Generation-aware tile/VMEM budget. ---
    vmem_cap = _vmem_capacity_bytes()
    big_vmem = vmem_cap >= 100 * 1024 * 1024          # v5e/v6e: 128 MiB per TC
    if x_block_bytes is None:
        # f32-equivalent per-block budget (in + out + resident scale/bias +
        # compiler temporaries all scale with it).
        x_block_bytes = (6 if big_vmem else 3) * 1024 * 1024
    if vmem_limit_bytes is None:
        vmem_limit_bytes = (100 if big_vmem else 48) * 1024 * 1024

    # --- Lane-dense 2-D view: row r of [T*B, C] is (t = r // B, b = r % B). ---
    x2 = x.reshape(rows, C)

    # Row tile: multiple of lcm(B, sublane) so (a) modulation repeats with
    # period B inside every tile and (b) the sublane dim stays aligned for the
    # packed dtype (f32: 8, bf16: 16, int8/fp8: 32).
    itemsize = jnp.dtype(x.dtype).itemsize
    sublane = max(8, 32 // itemsize)
    align = (B * sublane) // math.gcd(B, sublane)      # lcm(B, sublane)

    budget_rows = max(align, x_block_bytes // (C * 4))  # f32-equivalent rows
    budget_tile = max(align, (budget_rows // align) * align)

    min_steps = 8        # >= ~4 steps per TensorCore on v7x; keeps DMA pipelined
    cap = (rows // min_steps // align) * align
    if cap >= align:
        rows_tile = min(budget_tile, cap)
    elif rows >= align:
        rows_tile = align              # short sequence: maximize step count
    else:
        rows_tile = rows               # tiny input: single tile (rows = T*B)

    grid = (pl.cdiv(rows, rows_tile),)

    # Pre-tiled modulation: row j of (rows_tile, C) modulates batch j % B.
    # Correct because rows_tile (and hence every tile start) is a multiple of B.
    reps = rows_tile // B
    scale_t = jnp.tile(scale, (reps, 1))               # (rows_tile, C) f32
    bias_t = jnp.tile(bias, (reps, 1))                 # (rows_tile, C) f32

    kernel = functools.partial(_cond_ln_kernel, epsilon=epsilon)
    data_spec = pl.BlockSpec((rows_tile, C), lambda i: (i, 0))

    def run(single_buffer_modulation):
        if single_buffer_modulation:
            # Grid-invariant input: a second pipeline buffer buys nothing.
            mod_spec = pl.BlockSpec((rows_tile, C), lambda i: (0, 0),
                                    pipeline_mode=pl.Buffered(1))
        else:
            mod_spec = pl.BlockSpec((rows_tile, C), lambda i: (0, 0))
        return pl.pallas_call(
            kernel,
            out_shape=jax.ShapeDtypeStruct((rows, C), x.dtype),
            grid_spec=pltpu.PrefetchScalarGridSpec(
                num_scalar_prefetch=0,
                grid=grid,
                in_specs=[data_spec, mod_spec, mod_spec],
                out_specs=data_spec,
            ),
            compiler_params=pltpu.CompilerParams(
                dimension_semantics=("parallel",),
                vmem_limit_bytes=vmem_limit_bytes,
            ),
            input_output_aliases={0: 0} if donate_x else {},
        )(x2, scale_t, bias_t)

    try:
        out2 = run(True)
    except Exception:
        # Older JAX without BlockSpec pipeline_mode / Buffered(1) support.
        out2 = run(False)

    return out2.reshape(T, B, C)


def _reference(x, speaker_embedding, w_scale, b_scale, w_bias, b_bias,
               epsilon=1e-5):
    hi = jax.lax.Precision.HIGHEST
    mean = jnp.mean(x, axis=-1, keepdims=True)
    var = jnp.mean((x - mean) ** 2, axis=-1, keepdims=True)
    y = (x - mean) / jnp.sqrt(var + epsilon)
    scale = jnp.matmul(speaker_embedding, w_scale.T, precision=hi) + b_scale
    bias = jnp.matmul(speaker_embedding, w_bias.T, precision=hi) + b_bias
    scale = jnp.transpose(scale, (1, 0, 2))     # [1, B, C]
    bias = jnp.transpose(bias, (1, 0, 2))       # [1, B, C]
    return y * scale + bias


if __name__ == "__main__":
    T, B, C = 13, 2, 32   # rows = 26 -> 4 grid steps with a partial last tile
    epsilon = 1e-5

    key = jax.random.PRNGKey(0)
    kx, ks, kws, kbs, kwb, kbb = jax.random.split(key, 6)
    x = jax.random.normal(kx, (T, B, C), dtype=jnp.float32)
    speaker_embedding = jax.random.normal(ks, (B, 1, C), dtype=jnp.float32)

    # Non-trivial weights: exercise the projection path + partial last tile.
    w_scale = 0.1 * jax.random.normal(kws, (C, C), dtype=jnp.float32)
    b_scale = 1.0 + 0.1 * jax.random.normal(kbs, (C,), dtype=jnp.float32)
    w_bias = 0.1 * jax.random.normal(kwb, (C, C), dtype=jnp.float32)
    b_bias = 0.1 * jax.random.normal(kbb, (C,), dtype=jnp.float32)

    out = conditional_layer_norm(x, speaker_embedding, w_scale, b_scale,
                                 w_bias, b_bias, epsilon=epsilon)
    out = jax.block_until_ready(out)
    ref = _reference(x, speaker_embedding, w_scale, b_scale, w_bias, b_bias,
                     epsilon=epsilon)
    assert out.shape == (T, B, C)
    assert jnp.allclose(out, ref, atol=2e-5, rtol=2e-5), "mismatch (random init)"

    # Default module init: W_scale=0 (bias 1), W_bias=0 (bias 0) -> plain LN.
    w0 = jnp.zeros((C, C), jnp.float32)
    out0 = conditional_layer_norm(x, speaker_embedding,
                                  w0, jnp.ones((C,), jnp.float32),
                                  w0, jnp.zeros((C,), jnp.float32),
                                  epsilon=epsilon)
    out0 = jax.block_until_ready(out0)
    ref0 = _reference(x, speaker_embedding,
                      w0, jnp.ones((C,), jnp.float32),
                      w0, jnp.zeros((C,), jnp.float32), epsilon=epsilon)
    assert jnp.allclose(out0, ref0, atol=2e-5, rtol=2e-5), "mismatch (default init)"

    print("KERNEL_OK")
</pallas_src>

<mosaic_0001>
module attributes {stable_mosaic.version = 11 : i64} {
  func.func @_cond_ln_kernel(%arg0: i32, %arg1: memref<8x32xf32, #tpu.memory_space<vmem>>, %arg2: memref<8x32xf32, #tpu.memory_space<vmem>>, %arg3: memref<8x32xf32, #tpu.memory_space<vmem>>, %arg4: memref<8x32xf32, #tpu.memory_space<vmem>>) attributes {dimension_semantics = [#tpu.dimension_semantics<parallel>], iteration_bounds = array<i64: 4>, scalar_prefetch = 0 : i64, scratch_operands = 0 : i64, tpu.core_type = #tpu.core_type<tc>, window_params = [{transform_indices = @transform_0, window_bounds = array<i64: 8, 32>}, {pipeline_mode = #tpu.pipeline_mode<synchronous>, transform_indices = @transform_1, window_bounds = array<i64: 8, 32>}, {pipeline_mode = #tpu.pipeline_mode<synchronous>, transform_indices = @transform_2, window_bounds = array<i64: 8, 32>}, {transform_indices = @transform_3, window_bounds = array<i64: 8, 32>}]} {
    %c0 = arith.constant 0 : index
    %c0_0 = arith.constant 0 : index
    %0 = vector.load %arg1[%c0, %c0_0] : memref<8x32xf32, #tpu.memory_space<vmem>>, vector<8x32xf32>
    %cst = arith.constant dense<0.000000e+00> : vector<8xf32>
    %1 = vector.multi_reduction <add>, %0, %cst [1] : vector<8x32xf32> to vector<8xf32>
    %2 = vector.shape_cast %1 : vector<8xf32> to vector<8x1xf32>
    %cst_1 = arith.constant 3.200000e+01 : f32
    %3 = vector.broadcast %cst_1 : f32 to vector<8x1xf32>
    %4 = arith.divf %2, %3 : vector<8x1xf32>
    %5 = vector.broadcast %4 : vector<8x1xf32> to vector<8x32xf32>
    %6 = arith.subf %0, %5 : vector<8x32xf32>
    %7 = arith.mulf %6, %6 : vector<8x32xf32>
    %cst_2 = arith.constant dense<0.000000e+00> : vector<8xf32>
    %8 = vector.multi_reduction <add>, %7, %cst_2 [1] : vector<8x32xf32> to vector<8xf32>
    %9 = vector.shape_cast %8 : vector<8xf32> to vector<8x1xf32>
    %cst_3 = arith.constant 3.200000e+01 : f32
    %10 = vector.broadcast %cst_3 : f32 to vector<8x1xf32>
    %11 = arith.divf %9, %10 : vector<8x1xf32>
    %cst_4 = arith.constant 9.99999974E-6 : f32
    %12 = vector.broadcast %cst_4 : f32 to vector<8x1xf32>
    %13 = arith.addf %11, %12 : vector<8x1xf32>
    %14 = math.rsqrt %13 : vector<8x1xf32>
    %15 = vector.broadcast %14 : vector<8x1xf32> to vector<8x32xf32>
    %16 = arith.mulf %6, %15 : vector<8x32xf32>
    %c0_5 = arith.constant 0 : index
    %c0_6 = arith.constant 0 : index
    %17 = vector.load %arg2[%c0_5, %c0_6] : memref<8x32xf32, #tpu.memory_space<vmem>>, vector<8x32xf32>
    %18 = arith.mulf %16, %17 : vector<8x32xf32>
    %c0_7 = arith.constant 0 : index
    %c0_8 = arith.constant 0 : index
    %19 = vector.load %arg3[%c0_7, %c0_8] : memref<8x32xf32, #tpu.memory_space<vmem>>, vector<8x32xf32>
    %20 = arith.addf %18, %19 : vector<8x32xf32>
    %c0_9 = arith.constant 0 : index
    %c0_10 = arith.constant 0 : index
    %21 = vector.load %arg4[%c0_9, %c0_10] : memref<8x32xf32, #tpu.memory_space<vmem>>, vector<8x32xf32>
    tpu.vector_store %arg4[%c0_9, %c0_10], %20 {strides = array<i32>} : memref<8x32xf32, #tpu.memory_space<vmem>>, vector<8x32xf32>,
    return
  }
  func.func @transform_0(%arg0: i32) -> (i32, i32) {
    %c0_i32 = arith.constant 0 : i32
    %c0_i32_0 = arith.constant 0 : i32
    return %arg0, %c0_i32 : i32, i32
  }
  func.func @transform_1(%arg0: i32) -> (i32, i32) {
    %c0_i32 = arith.constant 0 : i32
    %c0_i32_0 = arith.constant 0 : i32
    %c0_i32_1 = arith.constant 0 : i32
    return %c0_i32, %c0_i32_0 : i32, i32
  }
  func.func @transform_2(%arg0: i32) -> (i32, i32) {
    %c0_i32 = arith.constant 0 : i32
    %c0_i32_0 = arith.constant 0 : i32
    %c0_i32_1 = arith.constant 0 : i32
    return %c0_i32, %c0_i32_0 : i32, i32
  }
  func.func @transform_3(%arg0: i32) -> (i32, i32) {
    %c0_i32 = arith.constant 0 : i32
    %c0_i32_0 = arith.constant 0 : i32
    return %arg0, %c0_i32 : i32, i32
  }
}

module attributes {stable_mosaic.version = 11 : i64} {
  func.func @_cond_ln_kernel(%arg0: i32, %arg1: memref<8x32xf32, #tpu.memory_space<vmem>>, %arg2: memref<8x32xf32, #tpu.memory_space<vmem>>, %arg3: memref<8x32xf32, #tpu.memory_space<vmem>>, %arg4: memref<8x32xf32, #tpu.memory_space<vmem>>) attributes {dimension_semantics = [#tpu.dimension_semantics<parallel>], iteration_bounds = array<i64: 4>, scalar_prefetch = 0 : i64, scratch_operands = 0 : i64, tpu.core_type = #tpu.core_type<tc>, window_params = [{transform_indices = @transform_0, window_bounds = array<i64: 8, 32>}, {pipeline_mode = #tpu.pipeline_mode<synchronous>, transform_indices = @transform_1, window_bounds = array<i64: 8, 32>}, {pipeline_mode = #tpu.pipeline_mode<synchronous>, transform_indices = @transform_2, window_bounds = array<i64: 8, 32>}, {transform_indices = @transform_3, window_bounds = array<i64: 8, 32>}]} {
    %c0 = arith.constant 0 : index
    %c0_0 = arith.constant 0 : index
    %0 = vector.load %arg1[%c0, %c0_0] : memref<8x32xf32, #tpu.memory_space<vmem>>, vector<8x32xf32>
    %cst = arith.constant dense<0.000000e+00> : vector<8xf32>
    %1 = vector.multi_reduction <add>, %0, %cst [1] : vector<8x32xf32> to vector<8xf32>
    %2 = vector.shape_cast %1 : vector<8xf32> to vector<8x1xf32>
    %cst_1 = arith.constant 3.200000e+01 : f32
    %3 = vector.broadcast %cst_1 : f32 to vector<8x1xf32>
    %4 = arith.divf %2, %3 : vector<8x1xf32>
    %5 = vector.broadcast %4 : vector<8x1xf32> to vector<8x32xf32>
    %6 = arith.subf %0, %5 : vector<8x32xf32>
    %7 = arith.mulf %6, %6 : vector<8x32xf32>
    %cst_2 = arith.constant dense<0.000000e+00> : vector<8xf32>
    %8 = vector.multi_reduction <add>, %7, %cst_2 [1] : vector<8x32xf32> to vector<8xf32>
    %9 = vector.shape_cast %8 : vector<8xf32> to vector<8x1xf32>
    %cst_3 = arith.constant 3.200000e+01 : f32
    %10 = vector.broadcast %cst_3 : f32 to vector<8x1xf32>
    %11 = arith.divf %9, %10 : vector<8x1xf32>
    %cst_4 = arith.constant 9.99999974E-6 : f32
    %12 = vector.broadcast %cst_4 : f32 to vector<8x1xf32>
    %13 = arith.addf %11, %12 : vector<8x1xf32>
    %14 = math.rsqrt %13 : vector<8x1xf32>
    %15 = vector.broadcast %14 : vector<8x1xf32> to vector<8x32xf32>
    %16 = arith.mulf %6, %15 : vector<8x32xf32>
    %c0_5 = arith.constant 0 : index
    %c0_6 = arith.constant 0 : index
    %17 = vector.load %arg2[%c0_5, %c0_6] : memref<8x32xf32, #tpu.memory_space<vmem>>, vector<8x32xf32>
    %18 = arith.mulf %16, %17 : vector<8x32xf32>
    %c0_7 = arith.constant 0 : index
    %c0_8 = arith.constant 0 : index
    %19 = vector.load %arg3[%c0_7, %c0_8] : memref<8x32xf32, #tpu.memory_space<vmem>>, vector<8x32xf32>
    %20 = arith.addf %18, %19 : vector<8x32xf32>
    %c0_9 = arith.constant 0 : index
    %c0_10 = arith.constant 0 : index
    %21 = vector.load %arg4[%c0_9, %c0_10] : memref<8x32xf32, #tpu.memory_space<vmem>>, vector<8x32xf32>
    tpu.vector_store %arg4[%c0_9, %c0_10], %20 {strides = array<i32>} : memref<8x32xf32, #tpu.memory_space<vmem>>, vector<8x32xf32>,
    return
  }
  func.func @transform_0(%arg0: i32) -> (i32, i32) {
    %c0_i32 = arith.constant 0 : i32
    %c0_i32_0 = arith.constant 0 : i32
    return %arg0, %c0_i32 : i32, i32
  }
  func.func @transform_1(%arg0: i32) -> (i32, i32) {
    %c0_i32 = arith.constant 0 : i32
    %c0_i32_0 = arith.constant 0 : i32
    %c0_i32_1 = arith.constant 0 : i32
    return %c0_i32, %c0_i32_0 : i32, i32
  }
  func.func @transform_2(%arg0: i32) -> (i32, i32) {
    %c0_i32 = arith.constant 0 : i32
    %c0_i32_0 = arith.constant 0 : i32
    %c0_i32_1 = arith.constant 0 : i32
    return %c0_i32, %c0_i32_0 : i32, i32
  }
  func.func @transform_3(%arg0: i32) -> (i32, i32) {
    %c0_i32 = arith.constant 0 : i32
    %c0_i32_0 = arith.constant 0 : i32
    return %arg0, %c0_i32 : i32, i32
  }
}

</mosaic_0001>

<bundles_post_ra>
// kernel: tpu_custom_call.1
= control target key start
LH: loop header
LB: loop body
LE: loop exit
PB: predicated region body
PF: predicated region fallthrough
CT: control target
= control target key end

     0   :  { %8 = vsyncpa [#allocation3], 0  ;;  %s777_s0 = inlined_call_operand.hbm [shape: f32[26,32], index: 0, kind: input, shape index: {}]   ;;  %s778_s1 = inlined_call_operand.hbm [shape: f32[8,32], index: 1, kind: input, shape index: {}]   ;;  %s779_s2 = inlined_call_operand.hbm [shape: f32[8,32], index: 2, kind: input, shape index: {}]   ;;  %s780_s3 = inlined_call_operand.hbm [shape: f32[26,32], index: 3, kind: output, shape index: {}]  }
   0x1   :  { %10 = vsyncpa [#allocation3 + $0x1], 0 }
   0x2   :  { %11 = vsyncpa [#allocation6], 0 }
   0x3   :  { %12 = vsyncpa [#allocation4], 0 }
   0x4   :  { %14 = vsyncpa [#allocation4 + $0x1], 0  ;;  %s631_s12 = smov 0   ;;  %s633_s13 = smov 0  }
   0x5   :  { %s635_s14 = smov 0   ;;  %s637_s15 = smov 0  }
   0x6 LB: > { %s652_s16 = sadd.s32 4294967295, %s606_s15   ;;  %s358_s17 = sadd.s32 4294967294, %s606_s15   ;;  %s606_s15 = sphi %s637_s15, %s789_s15   ;;  %s602_s14 = sphi %s635_s14, %s788_s14   ;;  %s598_s13 = sphi %s633_s13, %s787_s13   ;;  %s594_s12 = sphi %s631_s12, %s786_s12  }
   0x7   : > { %p40_p0 = scmp.ne.s32.totalorder %s598_s13, %s594_s12  ;;  %p41_p1 = scmp.eq.s32.totalorder %s652_s16, 0 }
   0x8   : > { %p106_p2 = scmp.eq.s32.totalorder %s652_s16, 3  ;;  %p112_p3 = scmp.eq.s32.totalorder %s358_s17, 3 }
   0x9   : > { %p661_p4 = por %p41_p1, %p40_p0  ;;  %p359_p5 = scmp.ge.s32.totalorder %s606_s15, 1 }
   0xa   : > { %p666_p6 = por %p112_p3, %p40_p0  ;;  %p119_p7 = scmp.lt.s32.totalorder %s606_s15, 5 }
   0xb   : > { %s131_s22 = sshll.u32 %s778_s1, 4  ;;  %s608_s24 = smov [#allocation5]   ;;  %s132_s22 = int_to_ptr.hbm [resolvable:$true] %s131_s22 }
   0xc   : > { %p674_p8 = pnand %p359_p5, %p119_p7  ;;  %s133_s25 = sshll.u32 %s608_s24, 4  ;;  %s134_s25 = int_to_ptr.vmem [resolvable:$true] %s133_s25 }
   0xd   : > { %s143_s28 = sshll.u32 %s779_s2, 4  ;;  %s609_s29 = smov [#allocation7]   ;;  %s144_s28 = int_to_ptr.hbm [resolvable:$true] %s143_s28 }
   0xe   : > { %p386_p9 = pneg %p674_p8  ;;  %s145_s30 = sshll.u32 %s609_s29, 4  ;;  %s146_s30 = int_to_ptr.vmem [resolvable:$true] %s145_s30 }
   0xf   : > { %s686_s4 = sadd.s32 1, %s606_s15   ;;  %s27_s5 = sadd.s32 1, %s602_s14 }
  0x10   : > { %p387_p10 = pnand %p386_p9, %p41_p1  ;;  %s24_s6 = ssub.s32 %s606_s15, %s686_s4 }
  0x11   : > { %p34_p11 = scmp.ne.s32.totalorder %s602_s14, %s598_s13  ;;  %p25_p12 = scmp.eq.s32.totalorder %s24_s6, 0 }
  0x12   : > { %389 = dma.hbm_to_vmem [thread:$0]  (!%p387_p10), %s132_s22, 128, %s134_s25, [#allocation6]  }
  0x13   : > { %392 = dma.hbm_to_vmem [thread:$0]  (!%p387_p10), %s144_s28, 128, %s146_s30, [#allocation6]  }
  0x14   : > { %p35_p13 = scmp.eq.s32.totalorder %s606_s15, 0  ;;  %p696_p0 = por %p106_p2, %p34_p11 }
  0x15   : > { %p403_p3 = scmp.lt.s32.totalorder %s606_s15, 4  ;;  %s156_s9 = sand.u32 1, %s602_s14  }
  0x16   : > { %s702_s8 = scalar_select %p25_p12, %s602_s14, %s27_s5  }
  0x17   : > { %p36_p5 = por %p35_p13, %p34_p11  ;;  %s363_s10 = sshll.u32 %s156_s9, 3 }
  0x18   : > { %s364_s11 = sshll.u32 %s606_s15, 3  ;;  %s160_s22 = scalar_lea.vmem [#allocation2], %s363_s10 }
  0x19   : > { %s164_s21 = scalar_lea.hbm %s777_s0, %s364_s11  ;;  %s168_s24 = sshll.u32 %s160_s22, 4  ;;  %s169_s24 = int_to_ptr.vmem [resolvable:$true] %s168_s24 }
  0x1a   : > { %s166_s25 = sshll.u32 %s164_s21, 4  ;;  %p709_p2 = pnand %p403_p3, %p36_p5  ;;  %s167_s25 = int_to_ptr.hbm [resolvable:$true] %s166_s25 }
  0x1b   : > { %s157_s27 = scalar_lea.sflag [#allocation3], %s156_s9  ;;  %s506_s28 = sshra.s32 %s167_s25, 4  ;;  %s507_s28 = int_to_ptr.hbm [resolvable:$true] %s506_s28 }
  0x1c   : > { %s508_s29 = scalar_lea.hbm %s507_s28, 8  ;;  %p510_p9 = pneg %p709_p2 }
  0x1d   : > { %p509_p7 = scmp.ne.s32.totalorder %s507_s28, %s508_s29  ;;  %s513_s6 = scalar_lea.hbm %s777_s0, 32 }
  0x1e   : > { %p514_p12 = scmp.lt.s32.totalorder %s507_s28, %s777_s0  ;;  %p515_p13 = scmp.lt.s32.totalorder %s513_s6, %s508_s29 }
  0x1f   : > { %p511_p10 = pnand %p510_p9, %p509_p7 }
  0x20   : > { %p516_p3 = por %p515_p13, %p514_p12 }
  0x21   : > { %p512_p11 = pneg %p511_p10 }
  0x23   : > { %p517_p5 = pnand %p516_p3, %p512_p11 }
  0x25   : > { %520 = shalt.err (!%p517_p5)
}
  0x26   : > { %396 = dma.hbm_to_vmem [thread:$0]  (!%p709_p2), %s167_s25, 128, %s169_s24, %s157_s27  }
  0x27   : > { %177 = sbr.rel (%p674_p8) target bundleno = 319 (0x13f), region = 32  ;;  %s726_s9 = sand.u32 (!%p674_p8), 1, %s598_s13  }
  0x28   : > { %s366_s17 = sshll.u32 (!%p674_p8), %s726_s9, 3  ;;  %s180_s20 = scalar_lea.sflag (!%p674_p8), [#allocation3], %s726_s9 }
  0x29   : > { %s183_s21 = scalar_lea.vmem (!%p674_p8), [#allocation2], %s366_s17 }
  0x2c   : > { %581 = dma.done.wait (%p661_p4), %s180_s20, 128  }
  0x2d   : > { %583 = vsyncadd (%p661_p4), %s180_s20, 4294967168 }
  0x2e   : > { %585 = dma.done.wait (%p41_p1), [#allocation6], 256  }
  0x2f   : > { %587 = vsyncadd (%p41_p1), [#allocation6], 4294967040  ;;  %vm218_vm0 = vcmask 261120   ;;  %v217_v0 = vld [vmem:[%s183_s21] sm:$0xff]  ;;  %v610_v2 = vmov 32.0   ;;  %s371_s18 = sshll.u32 %s652_s16, 3 }
  0x30   : > { %v219_v1 = vsel %vm218_vm0, %v217_v0, 0.0  ;;  %442 = vrcp.f32 %v610_v2  ;;  %s264_s24 = scalar_lea.hbm %s780_s3, %s371_s18  ;;  %v248_v23 = vld [vmem:[#allocation5] sm:$0xff]  ;;  %v250_v26 = vld [vmem:[#allocation7] sm:$0xff]  ;;  %s216_s25 = scalar_lea.vmem [#allocation8], %s366_s17 }
  0x31   : > { %220 = vadd.xlane.f32.xlu0 %v219_v1  ;;  %s266_s26 = sshll.u32 %s216_s25, 4  ;;  %s268_s27 = sshll.u32 %s264_s24, 4  ;;  %s267_s26 = int_to_ptr.vmem [resolvable:$true] %s266_s26  ;;  %s269_s27 = int_to_ptr.hbm [resolvable:$true] %s268_s27 }
  0x32   : > { %s254_s16 = scalar_lea.sflag [#allocation4], %s726_s9  ;;  %s550_s28 = sshra.s32 %s269_s27, 4  ;;  %s551_s28 = int_to_ptr.hbm [resolvable:$true] %s550_s28 }
  0x33   : > { %s552_s29 = scalar_lea.hbm %s551_s28, 8  ;;  %s556_s6 = scalar_lea.hbm %s780_s3, 32 }
  0x34   : > { %p553_p1 = scmp.ne.s32.totalorder %s551_s28, %s552_s29  ;;  %p557_p2 = scmp.lt.s32.totalorder %s551_s28, %s780_s3 }
  0x35   : > { %p558_p7 = scmp.lt.s32.totalorder %s556_s6, %s552_s29 }
  0x36   : > { %v443_v3 = vpop.eup %442  ;;  %p554_p4 = pnand %p553_p1, %p696_p0 }
  0x37   : > { %v223_v4 = vmul.f32 32.0, %v443_v3  ;;  %vm227_vm1 = vweird.f32 %v443_v3  ;;  %p559_p9 = por %p558_p7, %p557_p2 }
  0x38   : > { %p555_p8 = pneg %p554_p4 }
  0x39   : > { %v224_v5 = vsub.f32 1.0, %v223_v4 }
  0x3a   : > { %p560_p10 = pnand %p559_p9, %p555_p8 }
  0x3b   : > { %v225_v6 = vmul.f32 %v443_v3, %v224_v5 }
  0x3d   : > { %v226_v7 = vadd.f32 %v443_v3, %v225_v6 }
  0x3f   : > { %v228_v8 = vsel %vm227_vm1, %v443_v3, %v226_v7 }
  0xa4   : > { %v221_v9 = vpop.xlane.xlu0 %220 }
  0xa5   : > { %v229_v10 = vmul.f32 %v228_v8, %v221_v9 }
  0xa7   : > { %v230_v11 = vsub.f32 %v217_v0, %v229_v10 }
  0xa9   : > { %v231_v12 = vmul.f32 %v230_v11, %v230_v11 }
  0xab   : > { %v232_v13 = vsel %vm218_vm0, %v231_v12, 0.0 }
  0xac   : > { %233 = vadd.xlane.f32.xlu0 %v232_v13 }
 0x11f   : > { %v234_v14 = vpop.xlane.xlu0 %233 }
 0x120   : > { %v235_v15 = vmul.f32 %v234_v14, %v228_v8 }
 0x122   : > { %v236_v16 = vadd.f32 1e-05, %v235_v15 }
 0x124   : > { %444 = vrsqrt.f32 %v236_v16  ;;  %vm243_vm3 = vweird.f32 %v236_v16 }
 0x12a   : > { %v445_v17 = vpop.eup %444 }
 0x12b   : > { %v238_v18 = vmul.f32 %v445_v17, %v236_v16  ;;  %vm244_vm2 = vweird.f32 %v445_v17 }
 0x12c   : > { %vm245_vm4 = vmor %vm243_vm3, %vm244_vm2 }
 0x12d   : > { %v239_v19 = vmul.f32 %v445_v17, %v238_v18 }
 0x12f   : > { %v240_v20 = vmul.f32 0.5, %v239_v19 }
 0x131   : > { %v241_v21 = vsub.f32 1.5, %v240_v20 }
 0x133   : > { %v242_v22 = vmul.f32 %v445_v17, %v241_v21 }
 0x135   : > { %v246_v24 = vsel %vm245_vm4, %v445_v17, %v242_v22 }
 0x136   : > { %v247_v25 = vmul.f32 %v246_v24, %v230_v11 }
 0x138   : > { %v249_v27 = vmul.f32 %v248_v23, %v247_v25 }
 0x13a   : > { %v251_v28 = vadd.f32 %v250_v26, %v249_v27 }
 0x13c   : > { %252 = vst.msk [vmem:[%s216_s25] sm:$0xff] %vm218_vm0, %v251_v28 }
 0x13d   : > { %563 = shalt.err (!%p560_p10)
}
 0x13e   : > { %384 = dma.vmem_to_hbm [thread:$0]  (%p696_p0), %s267_s26, 128, %s269_s27, %s254_s16  }
 0x13f PF: > { %p406_p11 = scmp.ge.s32.totalorder %s606_s15, 2  ;;  %s280_s9 = sand.u32 1, %s594_s12  }
 0x140   : > { %s281_s17 = scalar_lea.sflag [#allocation4], %s280_s9 }
 0x141   : > { %p398_p12 = pnand %p406_p11, %p666_p6 }
 0x143   : > { %p399_p13 = pneg %p398_p12 }
 0x145   : > { %589 = dma.done.wait (%p399_p13), %s281_s17, 128  }
 0x146   : > { %591 = vsyncadd (%p399_p13), %s281_s17, 4294967168  ;;  %p17_p3 = scmp.ge.s32.totalorder %s686_s4, 6   ;;  %s786_s12 = smov %s598_s13 }
 0x147   : > { %s787_s13 = smov %s602_s14  ;;  %s788_s14 = smov %s702_s8 }
 0x148   : > { %s789_s15 = smov %s686_s4  ;;  %19 = sbr.rel (!%p17_p3) target bundleno = 6 (0x6), region = 85 }
 0x14d   :  { %287 = vsyncpa [#allocation3], 1 }
 0x14e   :  { %289 = vsyncpa [#allocation3 + $0x1], 1 }
 0x14f   :  { %290 = vsyncpa [#allocation6], 1 }
 0x150   :  { %291 = vsyncpa [#allocation4], 1 }
 0x151   :  { %293 = vsyncpa [#allocation4 + $0x1], 1 }

// kernel: tpu_custom_call.1
= control target key start
LH: loop header
LB: loop body
LE: loop exit
PB: predicated region body
PF: predicated region fallthrough
CT: control target
= control target key end

     0   :  { %8 = vsyncpa [#allocation3], 0  ;;  %s777_s0 = inlined_call_operand.hbm [shape: f32[26,32], index: 0, kind: input, shape index: {}]   ;;  %s778_s1 = inlined_call_operand.hbm [shape: f32[8,32], index: 1, kind: input, shape index: {}]   ;;  %s779_s2 = inlined_call_operand.hbm [shape: f32[8,32], index: 2, kind: input, shape index: {}]   ;;  %s780_s3 = inlined_call_operand.hbm [shape: f32[26,32], index: 3, kind: output, shape index: {}]  }
   0x1   :  { %10 = vsyncpa [#allocation3 + $0x1], 0 }
   0x2   :  { %11 = vsyncpa [#allocation6], 0 }
   0x3   :  { %12 = vsyncpa [#allocation4], 0 }
   0x4   :  { %14 = vsyncpa [#allocation4 + $0x1], 0  ;;  %s631_s12 = smov 0   ;;  %s633_s13 = smov 0  }
   0x5   :  { %s635_s14 = smov 0   ;;  %s637_s15 = smov 0  }
   0x6 LB: > { %s652_s16 = sadd.s32 4294967295, %s606_s15   ;;  %s358_s17 = sadd.s32 4294967294, %s606_s15   ;;  %s606_s15 = sphi %s637_s15, %s789_s15   ;;  %s602_s14 = sphi %s635_s14, %s788_s14   ;;  %s598_s13 = sphi %s633_s13, %s787_s13   ;;  %s594_s12 = sphi %s631_s12, %s786_s12  }
   0x7   : > { %p40_p0 = scmp.ne.s32.totalorder %s598_s13, %s594_s12  ;;  %p41_p1 = scmp.eq.s32.totalorder %s652_s16, 0 }
   0x8   : > { %p106_p2 = scmp.eq.s32.totalorder %s652_s16, 3  ;;  %p112_p3 = scmp.eq.s32.totalorder %s358_s17, 3 }
   0x9   : > { %p661_p4 = por %p41_p1, %p40_p0  ;;  %p359_p5 = scmp.ge.s32.totalorder %s606_s15, 1 }
   0xa   : > { %p666_p6 = por %p112_p3, %p40_p0  ;;  %p119_p7 = scmp.lt.s32.totalorder %s606_s15, 5 }
   0xb   : > { %s131_s22 = sshll.u32 %s778_s1, 4  ;;  %s608_s24 = smov [#allocation5]   ;;  %s132_s22 = int_to_ptr.hbm [resolvable:$true] %s131_s22 }
   0xc   : > { %p674_p8 = pnand %p359_p5, %p119_p7  ;;  %s133_s25 = sshll.u32 %s608_s24, 4  ;;  %s134_s25 = int_to_ptr.vmem [resolvable:$true] %s133_s25 }
   0xd   : > { %s143_s28 = sshll.u32 %s779_s2, 4  ;;  %s609_s29 = smov [#allocation7]   ;;  %s144_s28 = int_to_ptr.hbm [resolvable:$true] %s143_s28 }
   0xe   : > { %p386_p9 = pneg %p674_p8  ;;  %s145_s30 = sshll.u32 %s609_s29, 4  ;;  %s146_s30 = int_to_ptr.vmem [resolvable:$true] %s145_s30 }
   0xf   : > { %s686_s4 = sadd.s32 1, %s606_s15   ;;  %s27_s5 = sadd.s32 1, %s602_s14 }
  0x10   : > { %p387_p10 = pnand %p386_p9, %p41_p1  ;;  %s24_s6 = ssub.s32 %s606_s15, %s686_s4 }
  0x11   : > { %p34_p11 = scmp.ne.s32.totalorder %s602_s14, %s598_s13  ;;  %p25_p12 = scmp.eq.s32.totalorder %s24_s6, 0 }
  0x12   : > { %389 = dma.hbm_to_vmem [thread:$0]  (!%p387_p10), %s132_s22, 128, %s134_s25, [#allocation6]  }
  0x13   : > { %392 = dma.hbm_to_vmem [thread:$0]  (!%p387_p10), %s144_s28, 128, %s146_s30, [#allocation6]  }
  0x14   : > { %p35_p13 = scmp.eq.s32.totalorder %s606_s15, 0  ;;  %p696_p0 = por %p106_p2, %p34_p11 }
  0x15   : > { %p403_p3 = scmp.lt.s32.totalorder %s606_s15, 4  ;;  %s156_s9 = sand.u32 1, %s602_s14  }
  0x16   : > { %s702_s8 = scalar_select %p25_p12, %s602_s14, %s27_s5  }
  0x17   : > { %p36_p5 = por %p35_p13, %p34_p11  ;;  %s363_s10 = sshll.u32 %s156_s9, 3 }
  0x18   : > { %s364_s11 = sshll.u32 %s606_s15, 3  ;;  %s160_s22 = scalar_lea.vmem [#allocation2], %s363_s10 }
  0x19   : > { %s164_s21 = scalar_lea.hbm %s777_s0, %s364_s11  ;;  %s168_s24 = sshll.u32 %s160_s22, 4  ;;  %s169_s24 = int_to_ptr.vmem [resolvable:$true] %s168_s24 }
  0x1a   : > { %s166_s25 = sshll.u32 %s164_s21, 4  ;;  %p709_p2 = pnand %p403_p3, %p36_p5  ;;  %s167_s25 = int_to_ptr.hbm [resolvable:$true] %s166_s25 }
  0x1b   : > { %s157_s27 = scalar_lea.sflag [#allocation3], %s156_s9  ;;  %s506_s28 = sshra.s32 %s167_s25, 4  ;;  %s507_s28 = int_to_ptr.hbm [resolvable:$true] %s506_s28 }
  0x1c   : > { %s508_s29 = scalar_lea.hbm %s507_s28, 8  ;;  %p510_p9 = pneg %p709_p2 }
  0x1d   : > { %p509_p7 = scmp.ne.s32.totalorder %s507_s28, %s508_s29  ;;  %s513_s6 = scalar_lea.hbm %s777_s0, 32 }
  0x1e   : > { %p514_p12 = scmp.lt.s32.totalorder %s507_s28, %s777_s0  ;;  %p515_p13 = scmp.lt.s32.totalorder %s513_s6, %s508_s29 }
  0x1f   : > { %p511_p10 = pnand %p510_p9, %p509_p7 }
  0x20   : > { %p516_p3 = por %p515_p13, %p514_p12 }
  0x21   : > { %p512_p11 = pneg %p511_p10 }
  0x23   : > { %p517_p5 = pnand %p516_p3, %p512_p11 }
  0x25   : > { %520 = shalt.err (!%p517_p5)
}
  0x26   : > { %396 = dma.hbm_to_vmem [thread:$0]  (!%p709_p2), %s167_s25, 128, %s169_s24, %s157_s27  }
  0x27   : > { %177 = sbr.rel (%p674_p8) target bundleno = 319 (0x13f), region = 32  ;;  %s726_s9 = sand.u32 (!%p674_p8), 1, %s598_s13  }
  0x28   : > { %s366_s17 = sshll.u32 (!%p674_p8), %s726_s9, 3  ;;  %s180_s20 = scalar_lea.sflag (!%p674_p8), [#allocation3], %s726_s9 }
  0x29   : > { %s183_s21 = scalar_lea.vmem (!%p674_p8), [#allocation2], %s366_s17 }
  0x2c   : > { %581 = dma.done.wait (%p661_p4), %s180_s20, 128  }
  0x2d   : > { %583 = vsyncadd (%p661_p4), %s180_s20, 4294967168 }
  0x2e   : > { %585 = dma.done.wait (%p41_p1), [#allocation6], 256  }
  0x2f   : > { %587 = vsyncadd (%p41_p1), [#allocation6], 4294967040  ;;  %vm218_vm0 = vcmask 261120   ;;  %v217_v0 = vld [vmem:[%s183_s21] sm:$0xff]  ;;  %v610_v2 = vmov 32.0   ;;  %s371_s18 = sshll.u32 %s652_s16, 3 }
  0x30   : > { %v219_v1 = vsel %vm218_vm0, %v217_v0, 0.0  ;;  %442 = vrcp.f32 %v610_v2  ;;  %s264_s24 = scalar_lea.hbm %s780_s3, %s371_s18  ;;  %v248_v23 = vld [vmem:[#allocation5] sm:$0xff]  ;;  %v250_v26 = vld [vmem:[#allocation7] sm:$0xff]  ;;  %s216_s25 = scalar_lea.vmem [#allocation8], %s366_s17 }
  0x31   : > { %220 = vadd.xlane.f32.xlu0 %v219_v1  ;;  %s266_s26 = sshll.u32 %s216_s25, 4  ;;  %s268_s27 = sshll.u32 %s264_s24, 4  ;;  %s267_s26 = int_to_ptr.vmem [resolvable:$true] %s266_s26  ;;  %s269_s27 = int_to_ptr.hbm [resolvable:$true] %s268_s27 }
  0x32   : > { %s254_s16 = scalar_lea.sflag [#allocation4], %s726_s9  ;;  %s550_s28 = sshra.s32 %s269_s27, 4  ;;  %s551_s28 = int_to_ptr.hbm [resolvable:$true] %s550_s28 }
  0x33   : > { %s552_s29 = scalar_lea.hbm %s551_s28, 8  ;;  %s556_s6 = scalar_lea.hbm %s780_s3, 32 }
  0x34   : > { %p553_p1 = scmp.ne.s32.totalorder %s551_s28, %s552_s29  ;;  %p557_p2 = scmp.lt.s32.totalorder %s551_s28, %s780_s3 }
  0x35   : > { %p558_p7 = scmp.lt.s32.totalorder %s556_s6, %s552_s29 }
  0x36   : > { %v443_v3 = vpop.eup %442  ;;  %p554_p4 = pnand %p553_p1, %p696_p0 }
  0x37   : > { %v223_v4 = vmul.f32 32.0, %v443_v3  ;;  %vm227_vm1 = vweird.f32 %v443_v3  ;;  %p559_p9 = por %p558_p7, %p557_p2 }
  0x38   : > { %p555_p8 = pneg %p554_p4 }
  0x39   : > { %v224_v5 = vsub.f32 1.0, %v223_v4 }
  0x3a   : > { %p560_p10 = pnand %p559_p9, %p555_p8 }
  0x3b   : > { %v225_v6 = vmul.f32 %v443_v3, %v224_v5 }
  0x3d   : > { %v226_v7 = vadd.f32 %v443_v3, %v225_v6 }
  0x3f   : > { %v228_v8 = vsel %vm227_vm1, %v443_v3, %v226_v7 }
  0xa4   : > { %v221_v9 = vpop.xlane.xlu0 %220 }
  0xa5   : > { %v229_v10 = vmul.f32 %v228_v8, %v221_v9 }
  0xa7   : > { %v230_v11 = vsub.f32 %v217_v0, %v229_v10 }
  0xa9   : > { %v231_v12 = vmul.f32 %v230_v11, %v230_v11 }
  0xab   : > { %v232_v13 = vsel %vm218_vm0, %v231_v12, 0.0 }
  0xac   : > { %233 = vadd.xlane.f32.xlu0 %v232_v13 }
 0x11f   : > { %v234_v14 = vpop.xlane.xlu0 %233 }
 0x120   : > { %v235_v15 = vmul.f32 %v234_v14, %v228_v8 }
 0x122   : > { %v236_v16 = vadd.f32 1e-05, %v235_v15 }
 0x124   : > { %444 = vrsqrt.f32 %v236_v16  ;;  %vm243_vm3 = vweird.f32 %v236_v16 }
 0x12a   : > { %v445_v17 = vpop.eup %444 }
 0x12b   : > { %v238_v18 = vmul.f32 %v445_v17, %v236_v16  ;;  %vm244_vm2 = vweird.f32 %v445_v17 }
 0x12c   : > { %vm245_vm4 = vmor %vm243_vm3, %vm244_vm2 }
 0x12d   : > { %v239_v19 = vmul.f32 %v445_v17, %v238_v18 }
 0x12f   : > { %v240_v20 = vmul.f32 0.5, %v239_v19 }
 0x131   : > { %v241_v21 = vsub.f32 1.5, %v240_v20 }
 0x133   : > { %v242_v22 = vmul.f32 %v445_v17, %v241_v21 }
 0x135   : > { %v246_v24 = vsel %vm245_vm4, %v445_v17, %v242_v22 }
 0x136   : > { %v247_v25 = vmul.f32 %v246_v24, %v230_v11 }
 0x138   : > { %v249_v27 = vmul.f32 %v248_v23, %v247_v25 }
 0x13a   : > { %v251_v28 = vadd.f32 %v250_v26, %v249_v27 }
 0x13c   : > { %252 = vst.msk [vmem:[%s216_s25] sm:$0xff] %vm218_vm0, %v251_v28 }
 0x13d   : > { %563 = shalt.err (!%p560_p10)
}
 0x13e   : > { %384 = dma.vmem_to_hbm [thread:$0]  (%p696_p0), %s267_s26, 128, %s269_s27, %s254_s16  }
 0x13f PF: > { %p406_p11 = scmp.ge.s32.totalorder %s606_s15, 2  ;;  %s280_s9 = sand.u32 1, %s594_s12  }
 0x140   : > { %s281_s17 = scalar_lea.sflag [#allocation4], %s280_s9 }
 0x141   : > { %p398_p12 = pnand %p406_p11, %p666_p6 }
 0x143   : > { %p399_p13 = pneg %p398_p12 }
 0x145   : > { %589 = dma.done.wait (%p399_p13), %s281_s17, 128  }
 0x146   : > { %591 = vsyncadd (%p399_p13), %s281_s17, 4294967168  ;;  %p17_p3 = scmp.ge.s32.totalorder %s686_s4, 6   ;;  %s786_s12 = smov %s598_s13 }
 0x147   : > { %s787_s13 = smov %s602_s14  ;;  %s788_s14 = smov %s702_s8 }
 0x148   : > { %s789_s15 = smov %s686_s4  ;;  %19 = sbr.rel (!%p17_p3) target bundleno = 6 (0x6), region = 85 }
 0x14d   :  { %287 = vsyncpa [#allocation3], 1 }
 0x14e   :  { %289 = vsyncpa [#allocation3 + $0x1], 1 }
 0x14f   :  { %290 = vsyncpa [#allocation6], 1 }
 0x150   :  { %291 = vsyncpa [#allocation4], 1 }
 0x151   :  { %293 = vsyncpa [#allocation4 + $0x1], 1 }

</bundles_post_ra>
